<compile_context>
chip_gen: v7x
topology: tpu7x:2x2x1
jax: 0.10.0
libtpu: 0.0.40
codegen_flags: <defaults>
</compile_context>

<pallas_src>
import jax
import jax.numpy as jnp
from jax.experimental import pallas as pl
from jax.experimental.pallas import tpu as pltpu


def add_conv1x1_kernel(a_ref, b_ref, w_ref, o_ref):
    # a_ref, b_ref : (1, Cin, HW)  -- one batch row of the NCHW inputs, viewed (C, H*W)
    # w_ref        : (tc, Cin)     -- tile of the 1x1-conv weight (Cout-tile, Cin)
    # o_ref        : (1, tc, HW)
    x = a_ref[0] + b_ref[0]                              # elementwise add (VPU), f32
    o_ref[0] = jnp.dot(                                  # 1x1 conv == W @ X (MXU)
        w_ref[...], x, preferred_element_type=jnp.float32
    ).astype(o_ref.dtype)


def add_conv1x1(x128, x120, weight, *, cout_tile=None):
    """x128, x120: (N, Cin, H, W) NCHW.  weight: (Cout, Cin, 1, 1) PyTorch layout.
    Returns (N, Cout, H, W) NCHW.  No layout transposes anywhere."""
    N, Cin, H, W = x128.shape
    Cout = weight.shape[0]
    HW = H * W

    # Free reshapes (contiguous row-major views; no HBM traffic, no transposes).
    a = x128.reshape(N, Cin, HW)
    b = x120.reshape(N, Cin, HW)
    w = weight.reshape(Cout, Cin)

    # Tile Cout (sublane dim of the output) so the kernel generalizes; at
    # Cout=576 a single tile is used -> grid=(N, 1), no per-step overhead.
    if cout_tile is None:
        cout_tile = Cout if Cout <= 1024 else 256
    assert Cout % cout_tile == 0 and cout_tile % 8 == 0, (Cout, cout_tile)
    n_ct = Cout // cout_tile

    # Advisory cost hint so XLA schedules surrounding ops around this call.
    flops = 2 * N * HW * Cin * Cout + N * Cin * HW
    bytes_accessed = 4 * (2 * N * Cin * HW + Cout * Cin + N * Cout * HW)

    out3d = pl.pallas_call(
        add_conv1x1_kernel,
        out_shape=jax.ShapeDtypeStruct((N, Cout, HW), x128.dtype),
        grid_spec=pl.GridSpec(
            grid=(N, n_ct),
            in_specs=[
                pl.BlockSpec((1, Cin, HW), lambda n, c: (n, 0, 0)),
                pl.BlockSpec((1, Cin, HW), lambda n, c: (n, 0, 0)),
                pl.BlockSpec((cout_tile, Cin), lambda n, c: (c, 0)),
            ],
            out_specs=pl.BlockSpec((1, cout_tile, HW), lambda n, c: (n, c, 0)),
        ),
        compiler_params=pltpu.CompilerParams(
            # Both grid axes are independent (no accumulation) -> lets v7x
            # shard tiles across its 2 TensorCores; harmless on v5e/v6e.
            dimension_semantics=("parallel", "parallel"),
        ),
        cost_estimate=pl.CostEstimate(
            flops=flops, transcendentals=0, bytes_accessed=bytes_accessed
        ),
    )(a, b, w)

    # (N, Cout, H*W) -> NCHW is again a free reshape.
    return out3d.reshape(N, Cout, H, W)


if __name__ == "__main__":
    key = jax.random.PRNGKey(0)
    k1, k2, k3 = jax.random.split(key, 3)

    # Shapes implied by the module's forward: (1, 96, 7, 7) inputs.
    x128 = jax.random.normal(k1, (1, 96, 7, 7), dtype=jnp.float32)
    x120 = jax.random.normal(k2, (1, 96, 7, 7), dtype=jnp.float32)
    # Conv2d(96, 576, kernel_size=1, bias=False) weight, deterministic init.
    weight = jax.random.normal(k3, (576, 96, 1, 1), dtype=jnp.float32) * 0.02

    out = jax.block_until_ready(add_conv1x1(x128, x120, weight))

    # Reference (same semantics as the PyTorch module: add then 1x1 conv).
    ref = jnp.einsum("nchw,oc->nohw", x128 + x120, weight.reshape(576, 96))
    assert out.shape == (1, 576, 7, 7), out.shape
    assert jnp.allclose(out, ref, atol=1e-4, rtol=1e-4), "mismatch vs reference"

    print("KERNEL_OK")
</pallas_src>

<mosaic_0001>
module attributes {stable_mosaic.version = 11 : i64} {
  func.func @add_conv1x1_kernel(%arg0: i32, %arg1: i32, %arg2: memref<1x96x49xf32, #tpu.memory_space<vmem>>, %arg3: memref<1x96x49xf32, #tpu.memory_space<vmem>>, %arg4: memref<576x96xf32, #tpu.memory_space<vmem>>, %arg5: memref<1x576x49xf32, #tpu.memory_space<vmem>>) attributes {dimension_semantics = [#tpu.dimension_semantics<parallel>, #tpu.dimension_semantics<parallel>], iteration_bounds = array<i64: 1, 1>, scalar_prefetch = 0 : i64, scratch_operands = 0 : i64, tpu.core_type = #tpu.core_type<tc>, window_params = [{transform_indices = @transform_0, window_bounds = array<i64: 1, 96, 49>}, {transform_indices = @transform_1, window_bounds = array<i64: 1, 96, 49>}, {transform_indices = @transform_2, window_bounds = array<i64: 576, 96>}, {transform_indices = @transform_3, window_bounds = array<i64: 1, 576, 49>}]} {
    %c0 = arith.constant 0 : index
    %c0_0 = arith.constant 0 : index
    %c0_1 = arith.constant 0 : index
    %0 = vector.load %arg2[%c0, %c0_0, %c0_1] : memref<1x96x49xf32, #tpu.memory_space<vmem>>, vector<1x96x49xf32>
    %1 = vector.shape_cast %0 : vector<1x96x49xf32> to vector<96x49xf32>
    %c0_2 = arith.constant 0 : index
    %c0_3 = arith.constant 0 : index
    %c0_4 = arith.constant 0 : index
    %2 = vector.load %arg3[%c0_2, %c0_3, %c0_4] : memref<1x96x49xf32, #tpu.memory_space<vmem>>, vector<1x96x49xf32>
    %3 = vector.shape_cast %2 : vector<1x96x49xf32> to vector<96x49xf32>
    %4 = arith.addf %1, %3 : vector<96x49xf32>
    %c0_5 = arith.constant 0 : index
    %c0_6 = arith.constant 0 : index
    %5 = vector.load %arg4[%c0_5, %c0_6] : memref<576x96xf32, #tpu.memory_space<vmem>>, vector<576x96xf32>
    %cst = arith.constant dense<0.000000e+00> : vector<576x49xf32>
    %6 = tpu.matmul %5, %4, %cst {dimension_numbers = #tpu.dot_dimension_numbers<[1], [0], [0], [1], [0, 0, 1, 1], [], []>} : vector<576x96xf32>, vector<96x49xf32>, vector<576x49xf32> -> vector<576x49xf32>
    %c0_7 = arith.constant 0 : index
    %c0_8 = arith.constant 0 : index
    %c0_9 = arith.constant 0 : index
    %7 = vector.load %arg5[%c0_7, %c0_8, %c0_9] : memref<1x576x49xf32, #tpu.memory_space<vmem>>, vector<1x576x49xf32>
    %8 = vector.shape_cast %7 : vector<1x576x49xf32> to vector<576x49xf32>
    %9 = vector.shape_cast %6 : vector<576x49xf32> to vector<1x576x49xf32>
    tpu.vector_store %arg5[%c0_7, %c0_8, %c0_9], %9 {strides = array<i32>} : memref<1x576x49xf32, #tpu.memory_space<vmem>>, vector<1x576x49xf32>,
    return
  }
  func.func @transform_0(%arg0: i32, %arg1: i32) -> (i32, i32, i32) {
    %c0_i32 = arith.constant 0 : i32
    %c0_i32_0 = arith.constant 0 : i32
    %c0_i32_1 = arith.constant 0 : i32
    return %arg0, %c0_i32, %c0_i32_0 : i32, i32, i32
  }
  func.func @transform_1(%arg0: i32, %arg1: i32) -> (i32, i32, i32) {
    %c0_i32 = arith.constant 0 : i32
    %c0_i32_0 = arith.constant 0 : i32
    %c0_i32_1 = arith.constant 0 : i32
    return %arg0, %c0_i32, %c0_i32_0 : i32, i32, i32
  }
  func.func @transform_2(%arg0: i32, %arg1: i32) -> (i32, i32) {
    %c0_i32 = arith.constant 0 : i32
    %c0_i32_0 = arith.constant 0 : i32
    return %arg1, %c0_i32 : i32, i32
  }
  func.func @transform_3(%arg0: i32, %arg1: i32) -> (i32, i32, i32) {
    %c0_i32 = arith.constant 0 : i32
    %c0_i32_0 = arith.constant 0 : i32
    return %arg0, %arg1, %c0_i32 : i32, i32, i32
  }
}

</mosaic_0001>

<bundles_post_ra>
// kernel: tpu_custom_call.1
= control target key start
LH: loop header
LB: loop body
LE: loop exit
PB: predicated region body
PF: predicated region fallthrough
CT: control target
= control target key end

     0   :  { %vm122_vm0 = vcmask 785408   ;;  %vm764_vm1 = vcmask 400384   ;;  %s1833_s0 = inlined_call_operand.vmem [shape: f32[1,96,49], index: 0, kind: input, shape index: {}]   ;;  %s1834_s1 = inlined_call_operand.vmem [shape: f32[1,96,49], index: 1, kind: input, shape index: {}]   ;;  %s1835_s2 = inlined_call_operand.vmem [shape: f32[576,96], index: 2, kind: input, shape index: {}]   ;;  %s1836_s3 = inlined_call_operand.vmem [shape: f32[1,576,49], index: 3, kind: output, shape index: {}]  }
   0x1   :  { %v14_v0 = vld [vmem:[%s1833_s0] sm:$0xff]  ;;  %v15_v1 = vld [vmem:[%s1833_s0 + $0x8] sm:$0xff]  ;;  %v16_v5 = vld [vmem:[%s1833_s0 + $0x10] sm:$0xff] }
   0x2   :  { %v26_v2 = vld [vmem:[%s1834_s1] sm:$0xff]  ;;  %v27_v3 = vld [vmem:[%s1834_s1 + $0x8] sm:$0xff]  ;;  %v17_v6 = vld [vmem:[%s1833_s0 + $0x18] sm:$0xff] }
   0x3   :  { %v38_v4 = vadd.f32 %v26_v2, %v14_v0  ;;  %v39_v7 = vadd.f32 %v27_v3, %v15_v1  ;;  %v28_v8 = vld [vmem:[%s1834_s1 + $0x10] sm:$0xff]  ;;  %v29_v9 = vld [vmem:[%s1834_s1 + $0x18] sm:$0xff]  ;;  %v18_v10 = vld [vmem:[%s1833_s0 + $0x20] sm:$0xff] }
   0x4   :  { %v40_v11 = vadd.f32 %v28_v8, %v16_v5  ;;  %v41_v12 = vadd.f32 %v29_v9, %v17_v6  ;;  %v19_v13 = vld [vmem:[%s1833_s0 + $0x28] sm:$0xff]  ;;  %v30_v14 = vld [vmem:[%s1834_s1 + $0x20] sm:$0xff]  ;;  %v20_v19 = vld [vmem:[%s1833_s0 + $0x30] sm:$0xff] }
   0x5   :  { %v31_v15 = vld [vmem:[%s1834_s1 + $0x28] sm:$0xff]  ;;  %v1129_v16 = vpack.c.bf16 %v39_v7, %v38_v4  ;;  %v42_v17 = vadd.f32 %v30_v14, %v18_v10  ;;  %v21_v21 = vld [vmem:[%s1833_s0 + $0x38] sm:$0xff]  ;;  %v32_v22 = vld [vmem:[%s1834_s1 + $0x30] sm:$0xff] }
   0x6   :  { %v43_v18 = vadd.f32 %v31_v15, %v19_v13  ;;  %v1133_v20 = vpack.c.bf16 %v41_v12, %v40_v11  ;;  %v33_v23 = vld [vmem:[%s1834_s1 + $0x38] sm:$0xff]  ;;  %v44_v25 = vadd.f32 %v32_v22, %v20_v19  ;;  %v22_v27 = vld [vmem:[%s1833_s0 + $0x40] sm:$0xff]  ;;  %v23_v30 = vld [vmem:[%s1833_s0 + $0x48] sm:$0xff] }
   0x7   :  { %1130 = vmatprep.subr.bf16.mxu0 %v1129_v16  ;;  %1153 = vmatprep.subr.bf16.mxu1 %v1129_v16  ;;  %v45_v26 = vadd.f32 %v33_v23, %v21_v21  ;;  %v50_v28 = vld [vmem:[%s1835_s2] sm:$0xff]  ;;  %v35_v32 = vld [vmem:[%s1834_s1 + $0x48] sm:$0xff]  ;;  %v24_v36 = vld [vmem:[%s1833_s0 + $0x50] sm:$0xff] }
   0x8   :  { %1132 = vmatpush3.bf16.msra.mxu0 %v1129_v16  ;;  %1159 = vmatpush3.bf16.msra.mxu1 %v1129_v16  ;;  %v1137_v24 = vpack.c.bf16 %v43_v18, %v42_v17  ;;  %v86_v29 = vld [vmem:[%s1835_s2 + $0x120] sm:$0xff]  ;;  %v47_v35 = vadd.f32 %v35_v32, %v23_v30  ;;  %v25_v37 = vld [vmem:[%s1833_s0 + $0x58] sm:$0xff]  ;;  %v36_v38 = vld [vmem:[%s1834_s1 + $0x50] sm:$0xff] }
   0x9   :  { %1134 = vmatprep.subr.bf16.mxu0 %v1133_v20  ;;  %1154 = vmatprep.subr.bf16.mxu1 %v1133_v20  ;;  %v34_v31 = vld [vmem:[%s1834_s1 + $0x40] sm:$0xff]  ;;  %v1141_v33 = vpack.c.bf16 %v45_v26, %v44_v25  ;;  %v37_v39 = vld [vmem:[%s1834_s1 + $0x58] sm:$0xff]  ;;  %v48_v41 = vadd.f32 %v36_v38, %v24_v36  ;;  %v51_v44 = vld [vmem:[%s1835_s2 + $0x8] sm:$0xff] }
   0xa   :  { %1021 = vmatprep.mubr.msk.f32.mxu0 %vm122_vm0, %v50_v28  ;;  %1075 = vmatprep.mubr.msk.f32.mxu1 %vm122_vm0, %v86_v29  ;;  %v46_v34 = vadd.f32 %v34_v31, %v22_v27  ;;  %v49_v42 = vadd.f32 %v37_v39, %v25_v37  ;;  %v87_v45 = vld [vmem:[%s1835_s2 + $0x128] sm:$0xff]  ;;  %v52_v46 = vld [vmem:[%s1835_s2 + $0x10] sm:$0xff]  ;;  %v53_v48 = vld [vmem:[%s1835_s2 + $0x18] sm:$0xff] }
   0xb   :  { %v88_v47 = vld [vmem:[%s1835_s2 + $0x130] sm:$0xff]  ;;  %v89_v49 = vld [vmem:[%s1835_s2 + $0x138] sm:$0xff]  ;;  %v54_v50 = vld [vmem:[%s1835_s2 + $0x20] sm:$0xff] }
   0xc   :  { %1136 = vmatpush3.bf16.msra.mxu0 %v1133_v20  ;;  %1160 = vmatpush3.bf16.msra.mxu1 %v1133_v20  ;;  %v1145_v40 = vpack.c.bf16 %v47_v35, %v46_v34  ;;  %v1149_v43 = vpack.c.bf16 %v49_v42, %v48_v41  ;;  %v90_v51 = vld [vmem:[%s1835_s2 + $0x140] sm:$0xff]  ;;  %v55_v52 = vld [vmem:[%s1835_s2 + $0x28] sm:$0xff]  ;;  %v56_v54 = vld [vmem:[%s1835_s2 + $0x30] sm:$0xff] }
   0xd   :  { %1138 = vmatprep.subr.bf16.mxu0 %v1137_v24  ;;  %1155 = vmatprep.subr.bf16.mxu1 %v1137_v24  ;;  %v91_v53 = vld [vmem:[%s1835_s2 + $0x148] sm:$0xff]  ;;  %v92_v55 = vld [vmem:[%s1835_s2 + $0x150] sm:$0xff]  ;;  %v57_v56 = vld [vmem:[%s1835_s2 + $0x38] sm:$0xff] }
   0xe   :  { %v93_v57 = vld [vmem:[%s1835_s2 + $0x158] sm:$0xff]  ;;  %v58_v58 = vld [vmem:[%s1835_s2 + $0x40] sm:$0xff]  ;;  %v59_v60 = vld [vmem:[%s1835_s2 + $0x48] sm:$0xff] }
   0xf   :  { %v94_v59 = vld [vmem:[%s1835_s2 + $0x160] sm:$0xff]  ;;  %v95_v61 = vld [vmem:[%s1835_s2 + $0x168] sm:$0xff]  ;;  %v60_v62 = vld [vmem:[%s1835_s2 + $0x50] sm:$0xff] }
  0x10   :  { %1140 = vmatpush3.bf16.msra.mxu0 %v1137_v24  ;;  %1161 = vmatpush3.bf16.msra.mxu1 %v1137_v24  ;;  %v96_v63 = vld [vmem:[%s1835_s2 + $0x170] sm:$0xff]  ;;  %v61_v0 = vld [vmem:[%s1835_s2 + $0x58] sm:$0xff]  ;;  %v62_v2 = vld [vmem:[%s1835_s2 + $0x60] sm:$0xff] }
  0x11   :  { %1142 = vmatprep.subr.bf16.mxu0 %v1141_v33  ;;  %1156 = vmatprep.subr.bf16.mxu1 %v1141_v33  ;;  %v97_v1 = vld [vmem:[%s1835_s2 + $0x178] sm:$0xff]  ;;  %v98_v3 = vld [vmem:[%s1835_s2 + $0x180] sm:$0xff]  ;;  %v63_v4 = vld [vmem:[%s1835_s2 + $0x68] sm:$0xff] }
  0x12   :  { %v99_v5 = vld [vmem:[%s1835_s2 + $0x188] sm:$0xff]  ;;  %v64_v6 = vld [vmem:[%s1835_s2 + $0x70] sm:$0xff]  ;;  %v65_v8 = vld [vmem:[%s1835_s2 + $0x78] sm:$0xff] }
  0x13   :  { %v100_v7 = vld [vmem:[%s1835_s2 + $0x190] sm:$0xff]  ;;  %v101_v9 = vld [vmem:[%s1835_s2 + $0x198] sm:$0xff]  ;;  %v66_v10 = vld [vmem:[%s1835_s2 + $0x80] sm:$0xff] }
  0x14   :  { %1144 = vmatpush3.bf16.msra.mxu0 %v1141_v33  ;;  %1162 = vmatpush3.bf16.msra.mxu1 %v1141_v33  ;;  %v102_v11 = vld [vmem:[%s1835_s2 + $0x1a0] sm:$0xff]  ;;  %v67_v12 = vld [vmem:[%s1835_s2 + $0x88] sm:$0xff]  ;;  %v68_v14 = vld [vmem:[%s1835_s2 + $0x90] sm:$0xff] }
  0x15   :  { %1146 = vmatprep.subr.bf16.mxu0 %v1145_v40  ;;  %1157 = vmatprep.subr.bf16.mxu1 %v1145_v40  ;;  %v103_v13 = vld [vmem:[%s1835_s2 + $0x1a8] sm:$0xff]  ;;  %v104_v15 = vld [vmem:[%s1835_s2 + $0x1b0] sm:$0xff]  ;;  %v69_v16 = vld [vmem:[%s1835_s2 + $0x98] sm:$0xff] }
  0x16   :  { %v105_v17 = vld [vmem:[%s1835_s2 + $0x1b8] sm:$0xff]  ;;  %v70_v18 = vld [vmem:[%s1835_s2 + $0xa0] sm:$0xff]  ;;  %v71_v20 = vld [vmem:[%s1835_s2 + $0xa8] sm:$0xff] }
  0x17   :  { %v106_v19 = vld [vmem:[%s1835_s2 + $0x1c0] sm:$0xff]  ;;  %v107_v21 = vld [vmem:[%s1835_s2 + $0x1c8] sm:$0xff]  ;;  %v72_v22 = vld [vmem:[%s1835_s2 + $0xb0] sm:$0xff] }
  0x18   :  { %1148 = vmatpush3.bf16.msra.mxu0 %v1145_v40  ;;  %1163 = vmatpush3.bf16.msra.mxu1 %v1145_v40  ;;  %v108_v23 = vld [vmem:[%s1835_s2 + $0x1d0] sm:$0xff]  ;;  %v73_v24 = vld [vmem:[%s1835_s2 + $0xb8] sm:$0xff]  ;;  %v74_v26 = vld [vmem:[%s1835_s2 + $0xc0] sm:$0xff] }
  0x19   :  { %1150 = vmatprep.subr.bf16.mxu0 %v1149_v43  ;;  %1158 = vmatprep.subr.bf16.mxu1 %v1149_v43  ;;  %v109_v25 = vld [vmem:[%s1835_s2 + $0x1d8] sm:$0xff]  ;;  %v110_v27 = vld [vmem:[%s1835_s2 + $0x1e0] sm:$0xff]  ;;  %v75_v28 = vld [vmem:[%s1835_s2 + $0xc8] sm:$0xff] }
  0x1a   :  { %v111_v29 = vld [vmem:[%s1835_s2 + $0x1e8] sm:$0xff]  ;;  %v76_v30 = vld [vmem:[%s1835_s2 + $0xd0] sm:$0xff]  ;;  %v77_v32 = vld [vmem:[%s1835_s2 + $0xd8] sm:$0xff] }
  0x1b   :  { %v112_v31 = vld [vmem:[%s1835_s2 + $0x1f0] sm:$0xff]  ;;  %v113_v33 = vld [vmem:[%s1835_s2 + $0x1f8] sm:$0xff]  ;;  %v78_v34 = vld [vmem:[%s1835_s2 + $0xe0] sm:$0xff] }
  0x1c   :  { %1152 = vmatpush3.bf16.msra.mxu0 %v1149_v43  ;;  %1164 = vmatpush3.bf16.msra.mxu1 %v1149_v43  ;;  %v114_v35 = vld [vmem:[%s1835_s2 + $0x200] sm:$0xff]  ;;  %v79_v36 = vld [vmem:[%s1835_s2 + $0xe8] sm:$0xff]  ;;  %v80_v38 = vld [vmem:[%s1835_s2 + $0xf0] sm:$0xff] }
  0x1d   :  { %v115_v37 = vld [vmem:[%s1835_s2 + $0x208] sm:$0xff]  ;;  %v116_v39 = vld [vmem:[%s1835_s2 + $0x210] sm:$0xff]  ;;  %v81_v40 = vld [vmem:[%s1835_s2 + $0xf8] sm:$0xff] }
  0x1e   :  { %v117_v41 = vld [vmem:[%s1835_s2 + $0x218] sm:$0xff]  ;;  %v82_v42 = vld [vmem:[%s1835_s2 + $0x100] sm:$0xff] }
  0x1f   :  { %1022 = vmatmul.mubr.msk.f32.vlgmr.msra.gmra.mrb[0].mxu0 %vm122_vm0, %v51_v44  ;;  %1076 = vmatmul.mubr.msk.f32.vlgmr.msra.gmra.mrb[0].mxu1 %vm122_vm0, %v87_v45  ;;  %v118_v43 = vld [vmem:[%s1835_s2 + $0x220] sm:$0xff]  ;;  %v83_v44 = vld [vmem:[%s1835_s2 + $0x108] sm:$0xff] }
  0x20   :  { %1024 = vmatprep.mubr.msk.f32.mxu0 %vm122_vm0, %v52_v46  ;;  %1078 = vmatprep.mubr.msk.f32.mxu1 %vm122_vm0, %v88_v47  ;;  %v119_v45 = vld [vmem:[%s1835_s2 + $0x228] sm:$0xff]  ;;  %v84_v46 = vld [vmem:[%s1835_s2 + $0x110] sm:$0xff] }
  0x21   :  { %v120_v47 = vld [vmem:[%s1835_s2 + $0x230] sm:$0xff] }
  0x23   :  { %1025 = vmatmul.mubr.msk.f32.gmra.mrb[2].mxu0 %vm122_vm0, %v53_v48  ;;  %1079 = vmatmul.mubr.msk.f32.gmra.mrb[2].mxu1 %vm122_vm0, %v89_v49  ;;  %v85_v48 = vld [vmem:[%s1835_s2 + $0x118] sm:$0xff] }
  0x24   :  { %1027 = vmatprep.mubr.msk.f32.mxu0 %vm122_vm0, %v54_v50  ;;  %1081 = vmatprep.mubr.msk.f32.mxu1 %vm122_vm0, %v90_v51  ;;  %v121_v49 = vld [vmem:[%s1835_s2 + $0x238] sm:$0xff] }
  0x27   :  { %1028 = vmatmul.mubr.msk.f32.gmra.mrb[4].mxu0 %vm122_vm0, %v55_v52  ;;  %1082 = vmatmul.mubr.msk.f32.gmra.mrb[4].mxu1 %vm122_vm0, %v91_v53 }
  0x28   :  { %1030 = vmatprep.mubr.msk.f32.mxu0 %vm122_vm0, %v56_v54  ;;  %1084 = vmatprep.mubr.msk.f32.mxu1 %vm122_vm0, %v92_v55 }
  0x2b   :  { %1031 = vmatmul.mubr.msk.f32.gmra.mrb[6].mxu0 %vm122_vm0, %v57_v56  ;;  %1085 = vmatmul.mubr.msk.f32.gmra.mrb[6].mxu1 %vm122_vm0, %v93_v57 }
  0x2c   :  { %1033 = vmatprep.mubr.msk.f32.mxu0 %vm122_vm0, %v58_v58  ;;  %1087 = vmatprep.mubr.msk.f32.mxu1 %vm122_vm0, %v94_v59 }
  0x2f   :  { %1034 = vmatmul.mubr.msk.f32.gmra.mrb[8].mxu0 %vm122_vm0, %v59_v60  ;;  %1088 = vmatmul.mubr.msk.f32.gmra.mrb[8].mxu1 %vm122_vm0, %v95_v61 }
  0x30   :  { %1036 = vmatprep.mubr.msk.f32.mxu0 %vm122_vm0, %v60_v62  ;;  %1090 = vmatprep.mubr.msk.f32.mxu1 %vm122_vm0, %v96_v63 }
  0x33   :  { %1037 = vmatmul.mubr.msk.f32.gmra.mrb[10].mxu0 %vm122_vm0, %v61_v0  ;;  %1091 = vmatmul.mubr.msk.f32.gmra.mrb[10].mxu1 %vm122_vm0, %v97_v1 }
  0x34   :  { %1039 = vmatprep.mubr.msk.f32.mxu0 %vm122_vm0, %v62_v2  ;;  %1093 = vmatprep.mubr.msk.f32.mxu1 %vm122_vm0, %v98_v3 }
  0x37   :  { %1040 = vmatmul.mubr.msk.f32.gmra.mrb[12].mxu0 %vm122_vm0, %v63_v4  ;;  %1094 = vmatmul.mubr.msk.f32.gmra.mrb[12].mxu1 %vm122_vm0, %v99_v5 }
  0x38   :  { %1042 = vmatprep.mubr.msk.f32.mxu0 %vm122_vm0, %v64_v6  ;;  %1096 = vmatprep.mubr.msk.f32.mxu1 %vm122_vm0, %v100_v7 }
  0x3b   :  { %1043 = vmatmul.mubr.msk.f32.gmra.mrb[14].mxu0 %vm122_vm0, %v65_v8  ;;  %1097 = vmatmul.mubr.msk.f32.gmra.mrb[14].mxu1 %vm122_vm0, %v101_v9 }
  0x3c   :  { %1045 = vmatprep.mubr.msk.f32.mxu0 %vm122_vm0, %v66_v10  ;;  %1099 = vmatprep.mubr.msk.f32.mxu1 %vm122_vm0, %v102_v11 }
  0x3f   :  { %1046 = vmatmul.mubr.msk.f32.gmra.mrb[16].mxu0 %vm122_vm0, %v67_v12  ;;  %1100 = vmatmul.mubr.msk.f32.gmra.mrb[16].mxu1 %vm122_vm0, %v103_v13 }
  0x40   :  { %1048 = vmatprep.mubr.msk.f32.mxu0 %vm122_vm0, %v68_v14  ;;  %1102 = vmatprep.mubr.msk.f32.mxu1 %vm122_vm0, %v104_v15 }
  0x43   :  { %1049 = vmatmul.mubr.msk.f32.gmra.mrb[18].mxu0 %vm122_vm0, %v69_v16  ;;  %1103 = vmatmul.mubr.msk.f32.gmra.mrb[18].mxu1 %vm122_vm0, %v105_v17 }
  0x44   :  { %1051 = vmatprep.mubr.msk.f32.mxu0 %vm122_vm0, %v70_v18  ;;  %1105 = vmatprep.mubr.msk.f32.mxu1 %vm122_vm0, %v106_v19 }
  0x47   :  { %1052 = vmatmul.mubr.msk.f32.gmra.mrb[20].mxu0 %vm122_vm0, %v71_v20  ;;  %1106 = vmatmul.mubr.msk.f32.gmra.mrb[20].mxu1 %vm122_vm0, %v107_v21 }
  0x48   :  { %1054 = vmatprep.mubr.msk.f32.mxu0 %vm122_vm0, %v72_v22  ;;  %1108 = vmatprep.mubr.msk.f32.mxu1 %vm122_vm0, %v108_v23 }
  0x4b   :  { %1055 = vmatmul.mubr.msk.f32.gmra.mrb[22].mxu0 %vm122_vm0, %v73_v24  ;;  %1109 = vmatmul.mubr.msk.f32.gmra.mrb[22].mxu1 %vm122_vm0, %v109_v25 }
  0x4c   :  { %1057 = vmatprep.mubr.msk.f32.mxu0 %vm122_vm0, %v74_v26  ;;  %1111 = vmatprep.mubr.msk.f32.mxu1 %vm122_vm0, %v110_v27 }
  0x4f   :  { %1058 = vmatmul.mubr.msk.f32.gmra.mrb[24].mxu0 %vm122_vm0, %v75_v28  ;;  %1112 = vmatmul.mubr.msk.f32.gmra.mrb[24].mxu1 %vm122_vm0, %v111_v29 }
  0x50   :  { %1060 = vmatprep.mubr.msk.f32.mxu0 %vm122_vm0, %v76_v30  ;;  %1114 = vmatprep.mubr.msk.f32.mxu1 %vm122_vm0, %v112_v31 }
  0x53   :  { %1061 = vmatmul.mubr.msk.f32.gmra.mrb[26].mxu0 %vm122_vm0, %v77_v32  ;;  %1115 = vmatmul.mubr.msk.f32.gmra.mrb[26].mxu1 %vm122_vm0, %v113_v33 }
  0x54   :  { %1063 = vmatprep.mubr.msk.f32.mxu0 %vm122_vm0, %v78_v34  ;;  %1117 = vmatprep.mubr.msk.f32.mxu1 %vm122_vm0, %v114_v35 }
  0x57   :  { %1064 = vmatmul.mubr.msk.f32.gmra.mrb[28].mxu0 %vm122_vm0, %v79_v36  ;;  %1118 = vmatmul.mubr.msk.f32.gmra.mrb[28].mxu1 %vm122_vm0, %v115_v37 }
  0x58   :  { %1066 = vmatprep.mubr.msk.f32.mxu0 %vm122_vm0, %v80_v38  ;;  %1120 = vmatprep.mubr.msk.f32.mxu1 %vm122_vm0, %v116_v39 }
  0x5b   :  { %1067 = vmatmul.mubr.msk.f32.gmra.mrb[30].mxu0 %vm122_vm0, %v81_v40  ;;  %1121 = vmatmul.mubr.msk.f32.gmra.mrb[30].mxu1 %vm122_vm0, %v117_v41 }
  0x5c   :  { %1069 = vmatprep.mubr.msk.f32.mxu0 %vm122_vm0, %v82_v42  ;;  %1123 = vmatprep.mubr.msk.f32.mxu1 %vm122_vm0, %v118_v43 }
  0x5f   :  { %1070 = vmatmul.mubr.msk.f32.gmra.mrb[32].mxu0 %vm122_vm0, %v83_v44  ;;  %1124 = vmatmul.mubr.msk.f32.gmra.mrb[32].mxu1 %vm122_vm0, %v119_v45 }
  0x60   :  { %1072 = vmatprep.mubr.msk.f32.mxu0 %vm122_vm0, %v84_v46  ;;  %1126 = vmatprep.mubr.msk.f32.mxu1 %vm122_vm0, %v120_v47 }
  0x63   :  { %1073 = vmatmul.mubr.msk.f32.gmra.mrb[34].mxu0 %vm122_vm0, %v85_v48  ;;  %1127 = vmatmul.mubr.msk.f32.gmra.mrb[34].mxu1 %vm122_vm0, %v121_v49 }
  0xf2   :  { %v1023_v50 = vpop.f32.mrb[0].mxu0  ;;  %v1077_v51 = vpop.f32.mrb[0].mxu1 }
  0xf3   :  { %766 = vst.msk [vmem:[%s1836_s3 + $0x8] sm:$0xff] %vm764_vm1, %v1023_v50  ;;  %802 = vst.msk [vmem:[%s1836_s3 + $0x128] sm:$0xff] %vm764_vm1, %v1077_v51  ;;  %v405_v52 = vpop.f32.mrb[1].mxu0  ;;  %v585_v53 = vpop.f32.mrb[1].mxu1 }
  0xf4   :  { %765 = vst.msk [vmem:[%s1836_s3] sm:$0xff] %vm764_vm1, %v405_v52  ;;  %801 = vst.msk [vmem:[%s1836_s3 + $0x120] sm:$0xff] %vm764_vm1, %v585_v53 }
  0xf6   :  { %v1026_v54 = vpop.f32.mrb[2].mxu0  ;;  %v1080_v55 = vpop.f32.mrb[2].mxu1 }
  0xf7   :  { %768 = vst.msk [vmem:[%s1836_s3 + $0x18] sm:$0xff] %vm764_vm1, %v1026_v54  ;;  %804 = vst.msk [vmem:[%s1836_s3 + $0x138] sm:$0xff] %vm764_vm1, %v1080_v55  ;;  %v415_v56 = vpop.f32.mrb[3].mxu0  ;;  %v595_v57 = vpop.f32.mrb[3].mxu1 }
  0xf8   :  { %767 = vst.msk [vmem:[%s1836_s3 + $0x10] sm:$0xff] %vm764_vm1, %v415_v56  ;;  %803 = vst.msk [vmem:[%s1836_s3 + $0x130] sm:$0xff] %vm764_vm1, %v595_v57 }
  0xfa   :  { %v1029_v58 = vpop.f32.mrb[4].mxu0  ;;  %v1083_v59 = vpop.f32.mrb[4].mxu1 }
  0xfb   :  { %770 = vst.msk [vmem:[%s1836_s3 + $0x28] sm:$0xff] %vm764_vm1, %v1029_v58  ;;  %806 = vst.msk [vmem:[%s1836_s3 + $0x148] sm:$0xff] %vm764_vm1, %v1083_v59  ;;  %v425_v60 = vpop.f32.mrb[5].mxu0  ;;  %v605_v61 = vpop.f32.mrb[5].mxu1 }
  0xfc   :  { %769 = vst.msk [vmem:[%s1836_s3 + $0x20] sm:$0xff] %vm764_vm1, %v425_v60  ;;  %805 = vst.msk [vmem:[%s1836_s3 + $0x140] sm:$0xff] %vm764_vm1, %v605_v61 }
  0xfe   :  { %v1032_v62 = vpop.f32.mrb[6].mxu0  ;;  %v1086_v63 = vpop.f32.mrb[6].mxu1 }
  0xff   :  { %772 = vst.msk [vmem:[%s1836_s3 + $0x38] sm:$0xff] %vm764_vm1, %v1032_v62  ;;  %808 = vst.msk [vmem:[%s1836_s3 + $0x158] sm:$0xff] %vm764_vm1, %v1086_v63  ;;  %v435_v0 = vpop.f32.mrb[7].mxu0  ;;  %v615_v1 = vpop.f32.mrb[7].mxu1 }
 0x100   :  { %771 = vst.msk [vmem:[%s1836_s3 + $0x30] sm:$0xff] %vm764_vm1, %v435_v0  ;;  %807 = vst.msk [vmem:[%s1836_s3 + $0x150] sm:$0xff] %vm764_vm1, %v615_v1 }
 0x102   :  { %v1035_v2 = vpop.f32.mrb[8].mxu0  ;;  %v1089_v3 = vpop.f32.mrb[8].mxu1 }
 0x103   :  { %774 = vst.msk [vmem:[%s1836_s3 + $0x48] sm:$0xff] %vm764_vm1, %v1035_v2  ;;  %810 = vst.msk [vmem:[%s1836_s3 + $0x168] sm:$0xff] %vm764_vm1, %v1089_v3  ;;  %v445_v4 = vpop.f32.mrb[9].mxu0  ;;  %v625_v5 = vpop.f32.mrb[9].mxu1 }
 0x104   :  { %773 = vst.msk [vmem:[%s1836_s3 + $0x40] sm:$0xff] %vm764_vm1, %v445_v4  ;;  %809 = vst.msk [vmem:[%s1836_s3 + $0x160] sm:$0xff] %vm764_vm1, %v625_v5 }
 0x106   :  { %v1038_v6 = vpop.f32.mrb[10].mxu0  ;;  %v1092_v7 = vpop.f32.mrb[10].mxu1 }
 0x107   :  { %776 = vst.msk [vmem:[%s1836_s3 + $0x58] sm:$0xff] %vm764_vm1, %v1038_v6  ;;  %812 = vst.msk [vmem:[%s1836_s3 + $0x178] sm:$0xff] %vm764_vm1, %v1092_v7  ;;  %v455_v8 = vpop.f32.mrb[11].mxu0  ;;  %v635_v9 = vpop.f32.mrb[11].mxu1 }
 0x108   :  { %775 = vst.msk [vmem:[%s1836_s3 + $0x50] sm:$0xff] %vm764_vm1, %v455_v8  ;;  %811 = vst.msk [vmem:[%s1836_s3 + $0x170] sm:$0xff] %vm764_vm1, %v635_v9 }
 0x10a   :  { %v1041_v10 = vpop.f32.mrb[12].mxu0  ;;  %v1095_v11 = vpop.f32.mrb[12].mxu1 }
 0x10b   :  { %778 = vst.msk [vmem:[%s1836_s3 + $0x68] sm:$0xff] %vm764_vm1, %v1041_v10  ;;  %814 = vst.msk [vmem:[%s1836_s3 + $0x188] sm:$0xff] %vm764_vm1, %v1095_v11  ;;  %v465_v12 = vpop.f32.mrb[13].mxu0  ;;  %v645_v13 = vpop.f32.mrb[13].mxu1 }
 0x10c   :  { %777 = vst.msk [vmem:[%s1836_s3 + $0x60] sm:$0xff] %vm764_vm1, %v465_v12  ;;  %813 = vst.msk [vmem:[%s1836_s3 + $0x180] sm:$0xff] %vm764_vm1, %v645_v13 }
 0x10e   :  { %v1044_v14 = vpop.f32.mrb[14].mxu0  ;;  %v1098_v15 = vpop.f32.mrb[14].mxu1 }
 0x10f   :  { %780 = vst.msk [vmem:[%s1836_s3 + $0x78] sm:$0xff] %vm764_vm1, %v1044_v14  ;;  %816 = vst.msk [vmem:[%s1836_s3 + $0x198] sm:$0xff] %vm764_vm1, %v1098_v15  ;;  %v475_v16 = vpop.f32.mrb[15].mxu0  ;;  %v655_v17 = vpop.f32.mrb[15].mxu1 }
 0x110   :  { %779 = vst.msk [vmem:[%s1836_s3 + $0x70] sm:$0xff] %vm764_vm1, %v475_v16  ;;  %815 = vst.msk [vmem:[%s1836_s3 + $0x190] sm:$0xff] %vm764_vm1, %v655_v17 }
 0x112   :  { %v1047_v18 = vpop.f32.mrb[16].mxu0  ;;  %v1101_v19 = vpop.f32.mrb[16].mxu1 }
 0x113   :  { %782 = vst.msk [vmem:[%s1836_s3 + $0x88] sm:$0xff] %vm764_vm1, %v1047_v18  ;;  %818 = vst.msk [vmem:[%s1836_s3 + $0x1a8] sm:$0xff] %vm764_vm1, %v1101_v19  ;;  %v485_v20 = vpop.f32.mrb[17].mxu0  ;;  %v665_v21 = vpop.f32.mrb[17].mxu1 }
 0x114   :  { %781 = vst.msk [vmem:[%s1836_s3 + $0x80] sm:$0xff] %vm764_vm1, %v485_v20  ;;  %817 = vst.msk [vmem:[%s1836_s3 + $0x1a0] sm:$0xff] %vm764_vm1, %v665_v21 }
 0x116   :  { %v1050_v22 = vpop.f32.mrb[18].mxu0  ;;  %v1104_v23 = vpop.f32.mrb[18].mxu1 }
 0x117   :  { %784 = vst.msk [vmem:[%s1836_s3 + $0x98] sm:$0xff] %vm764_vm1, %v1050_v22  ;;  %820 = vst.msk [vmem:[%s1836_s3 + $0x1b8] sm:$0xff] %vm764_vm1, %v1104_v23  ;;  %v495_v24 = vpop.f32.mrb[19].mxu0  ;;  %v675_v25 = vpop.f32.mrb[19].mxu1 }
 0x118   :  { %783 = vst.msk [vmem:[%s1836_s3 + $0x90] sm:$0xff] %vm764_vm1, %v495_v24  ;;  %819 = vst.msk [vmem:[%s1836_s3 + $0x1b0] sm:$0xff] %vm764_vm1, %v675_v25 }
 0x11a   :  { %v1053_v26 = vpop.f32.mrb[20].mxu0  ;;  %v1107_v27 = vpop.f32.mrb[20].mxu1 }
 0x11b   :  { %786 = vst.msk [vmem:[%s1836_s3 + $0xa8] sm:$0xff] %vm764_vm1, %v1053_v26  ;;  %822 = vst.msk [vmem:[%s1836_s3 + $0x1c8] sm:$0xff] %vm764_vm1, %v1107_v27  ;;  %v505_v28 = vpop.f32.mrb[21].mxu0  ;;  %v685_v29 = vpop.f32.mrb[21].mxu1 }
 0x11c   :  { %785 = vst.msk [vmem:[%s1836_s3 + $0xa0] sm:$0xff] %vm764_vm1, %v505_v28  ;;  %821 = vst.msk [vmem:[%s1836_s3 + $0x1c0] sm:$0xff] %vm764_vm1, %v685_v29 }
 0x11e   :  { %v1056_v30 = vpop.f32.mrb[22].mxu0  ;;  %v1110_v31 = vpop.f32.mrb[22].mxu1 }
 0x11f   :  { %788 = vst.msk [vmem:[%s1836_s3 + $0xb8] sm:$0xff] %vm764_vm1, %v1056_v30  ;;  %824 = vst.msk [vmem:[%s1836_s3 + $0x1d8] sm:$0xff] %vm764_vm1, %v1110_v31  ;;  %v515_v32 = vpop.f32.mrb[23].mxu0  ;;  %v695_v33 = vpop.f32.mrb[23].mxu1 }
 0x120   :  { %787 = vst.msk [vmem:[%s1836_s3 + $0xb0] sm:$0xff] %vm764_vm1, %v515_v32  ;;  %823 = vst.msk [vmem:[%s1836_s3 + $0x1d0] sm:$0xff] %vm764_vm1, %v695_v33 }
 0x122   :  { %v1059_v34 = vpop.f32.mrb[24].mxu0  ;;  %v1113_v35 = vpop.f32.mrb[24].mxu1 }
 0x123   :  { %790 = vst.msk [vmem:[%s1836_s3 + $0xc8] sm:$0xff] %vm764_vm1, %v1059_v34  ;;  %826 = vst.msk [vmem:[%s1836_s3 + $0x1e8] sm:$0xff] %vm764_vm1, %v1113_v35  ;;  %v525_v36 = vpop.f32.mrb[25].mxu0  ;;  %v705_v37 = vpop.f32.mrb[25].mxu1 }
 0x124   :  { %789 = vst.msk [vmem:[%s1836_s3 + $0xc0] sm:$0xff] %vm764_vm1, %v525_v36  ;;  %825 = vst.msk [vmem:[%s1836_s3 + $0x1e0] sm:$0xff] %vm764_vm1, %v705_v37 }
 0x126   :  { %v1062_v38 = vpop.f32.mrb[26].mxu0  ;;  %v1116_v39 = vpop.f32.mrb[26].mxu1 }
 0x127   :  { %792 = vst.msk [vmem:[%s1836_s3 + $0xd8] sm:$0xff] %vm764_vm1, %v1062_v38  ;;  %828 = vst.msk [vmem:[%s1836_s3 + $0x1f8] sm:$0xff] %vm764_vm1, %v1116_v39  ;;  %v535_v40 = vpop.f32.mrb[27].mxu0  ;;  %v715_v41 = vpop.f32.mrb[27].mxu1 }
 0x128   :  { %791 = vst.msk [vmem:[%s1836_s3 + $0xd0] sm:$0xff] %vm764_vm1, %v535_v40  ;;  %827 = vst.msk [vmem:[%s1836_s3 + $0x1f0] sm:$0xff] %vm764_vm1, %v715_v41 }
 0x12a   :  { %v1065_v42 = vpop.f32.mrb[28].mxu0  ;;  %v1119_v43 = vpop.f32.mrb[28].mxu1 }
 0x12b   :  { %794 = vst.msk [vmem:[%s1836_s3 + $0xe8] sm:$0xff] %vm764_vm1, %v1065_v42  ;;  %830 = vst.msk [vmem:[%s1836_s3 + $0x208] sm:$0xff] %vm764_vm1, %v1119_v43  ;;  %v545_v44 = vpop.f32.mrb[29].mxu0  ;;  %v725_v45 = vpop.f32.mrb[29].mxu1 }
 0x12c   :  { %793 = vst.msk [vmem:[%s1836_s3 + $0xe0] sm:$0xff] %vm764_vm1, %v545_v44  ;;  %829 = vst.msk [vmem:[%s1836_s3 + $0x200] sm:$0xff] %vm764_vm1, %v725_v45 }
 0x12e   :  { %v1068_v46 = vpop.f32.mrb[30].mxu0  ;;  %v1122_v47 = vpop.f32.mrb[30].mxu1 }
 0x12f   :  { %796 = vst.msk [vmem:[%s1836_s3 + $0xf8] sm:$0xff] %vm764_vm1, %v1068_v46  ;;  %832 = vst.msk [vmem:[%s1836_s3 + $0x218] sm:$0xff] %vm764_vm1, %v1122_v47  ;;  %v555_v48 = vpop.f32.mrb[31].mxu0  ;;  %v735_v49 = vpop.f32.mrb[31].mxu1 }
 0x130   :  { %795 = vst.msk [vmem:[%s1836_s3 + $0xf0] sm:$0xff] %vm764_vm1, %v555_v48  ;;  %831 = vst.msk [vmem:[%s1836_s3 + $0x210] sm:$0xff] %vm764_vm1, %v735_v49 }
 0x132   :  { %v1071_v50 = vpop.f32.mrb[32].mxu0  ;;  %v1125_v51 = vpop.f32.mrb[32].mxu1 }
 0x133   :  { %798 = vst.msk [vmem:[%s1836_s3 + $0x108] sm:$0xff] %vm764_vm1, %v1071_v50  ;;  %834 = vst.msk [vmem:[%s1836_s3 + $0x228] sm:$0xff] %vm764_vm1, %v1125_v51  ;;  %v565_v52 = vpop.f32.mrb[33].mxu0  ;;  %v745_v53 = vpop.f32.mrb[33].mxu1 }
 0x134   :  { %797 = vst.msk [vmem:[%s1836_s3 + $0x100] sm:$0xff] %vm764_vm1, %v565_v52  ;;  %833 = vst.msk [vmem:[%s1836_s3 + $0x220] sm:$0xff] %vm764_vm1, %v745_v53 }
 0x136   :  { %v1074_v54 = vpop.f32.mrb[34].mxu0  ;;  %v1128_v55 = vpop.f32.mrb[34].mxu1 }
 0x137   :  { %800 = vst.msk [vmem:[%s1836_s3 + $0x118] sm:$0xff] %vm764_vm1, %v1074_v54  ;;  %836 = vst.msk [vmem:[%s1836_s3 + $0x238] sm:$0xff] %vm764_vm1, %v1128_v55  ;;  %v575_v56 = vpop.f32.mrb[35].mxu0  ;;  %v755_v57 = vpop.f32.mrb[35].mxu1 }
 0x138   :  { %799 = vst.msk [vmem:[%s1836_s3 + $0x110] sm:$0xff] %vm764_vm1, %v575_v56  ;;  %835 = vst.msk [vmem:[%s1836_s3 + $0x230] sm:$0xff] %vm764_vm1, %v755_v57 }

</bundles_post_ra>
